<compile_context>
chip_gen: v7x
topology: tpu7x:2x2x1
jax: 0.10.0
libtpu: 0.0.40
codegen_flags: <defaults>
</compile_context>

<pallas_src>
import functools

import jax
import jax.numpy as jnp
from jax.experimental import pallas as pl
from jax.experimental.pallas import tpu as pltpu


# ---------------------------------------------------------------------------
# Fused Pallas kernel: Linear -> Tanh -> Linear -> Tanh -> Linear
# ---------------------------------------------------------------------------
def _zsdiff_kernel(x_ref, w1_ref, b1_ref, w2_ref, b2_ref, w3_ref, b3_ref, o_ref):
    x = x_ref[...]

    # Layer 1: Linear(D_in, H1) + Tanh  (tanh -> EUP slot, overlaps with MXU)
    h = jnp.dot(x, w1_ref[...], preferred_element_type=jnp.float32)
    h = jnp.tanh(h + b1_ref[...])

    # Layer 2: Linear(H1, H2) + Tanh
    h = jnp.dot(h, w2_ref[...], preferred_element_type=jnp.float32)
    h = jnp.tanh(h + b2_ref[...])

    # Layer 3: Linear(H2, 1)
    y = jnp.dot(h, w3_ref[...], preferred_element_type=jnp.float32) + b3_ref[...]
    o_ref[...] = y.astype(o_ref.dtype)


def zsdiff_forward(x, params, *, block_b=512):
    """Fused ZSDiff MLP forward: tanh(tanh(x @ W1 + b1) @ W2 + b2) @ W3 + b3."""
    B, D = x.shape
    w1, b1 = params["w1"], params["b1"]
    w2, b2 = params["w2"], params["b2"]
    w3, b3 = params["w3"], params["b3"]
    H1 = w1.shape[1]
    H2 = w2.shape[1]
    N = w3.shape[1]

    # Batch tiling: whole batch in one block unless it is large, in which case
    # tile with a sublane-aligned block and shard the grid across TensorCores.
    if B <= block_b:
        block_b = B
        B_pad = B
    else:
        # Pad batch up to a multiple of the tile so the grid covers it exactly.
        B_pad = pl.cdiv(B, block_b) * block_b
        if B_pad != B:
            x = jnp.pad(x, ((0, B_pad - B), (0, 0)))
    grid = (B_pad // block_b,)

    flops = 2 * B_pad * (D * H1 + H1 * H2 + H2 * N)
    transcendentals = B_pad * (H1 + H2)  # tanh count
    bytes_accessed = 4 * (
        B_pad * D + D * H1 + H1 + H1 * H2 + H2 + H2 * N + N + B_pad * N
    )

    out = pl.pallas_call(
        _zsdiff_kernel,
        out_shape=jax.ShapeDtypeStruct((B_pad, N), jnp.float32),
        grid=grid,
        in_specs=[
            pl.BlockSpec((block_b, D), lambda i: (i, 0)),   # x tile
            pl.BlockSpec((D, H1), lambda i: (0, 0)),        # W1 (VMEM resident)
            pl.BlockSpec((1, H1), lambda i: (0, 0)),        # b1
            pl.BlockSpec((H1, H2), lambda i: (0, 0)),       # W2
            pl.BlockSpec((1, H2), lambda i: (0, 0)),        # b2
            pl.BlockSpec((H2, N), lambda i: (0, 0)),        # W3
            pl.BlockSpec((1, N), lambda i: (0, 0)),         # b3
        ],
        out_specs=pl.BlockSpec((block_b, N), lambda i: (i, 0)),
        compiler_params=pltpu.CompilerParams(
            dimension_semantics=("parallel",)),             # v7x: shard batch over 2 TCs
        cost_estimate=pl.CostEstimate(
            flops=flops,
            transcendentals=transcendentals,
            bytes_accessed=bytes_accessed),
    )(x, w1, b1.reshape(1, H1), w2, b2.reshape(1, H2), w3, b3.reshape(1, N))

    if B_pad != B:
        out = out[:B]
    return out


# ---------------------------------------------------------------------------
# Parameter init matching the module's __init__:
#   all weights ~ N(0, 0.1); all biases = 0 (nn.init.constant_(..., 0.0)).
#   Weights stored already transposed to (in, out) for y = x @ W + b.
# ---------------------------------------------------------------------------
def init_params(key, anion_latent_dim, cation_latent_dim):
    d_in = anion_latent_dim + cation_latent_dim
    h1 = anion_latent_dim
    h2 = 30
    n_out = 1
    k1, k2, k3 = jax.random.split(key, 3)
    return dict(
        w1=0.1 * jax.random.normal(k1, (d_in, h1), jnp.float32),
        b1=jnp.zeros((h1,), jnp.float32),
        w2=0.1 * jax.random.normal(k2, (h1, h2), jnp.float32),
        b2=jnp.zeros((h2,), jnp.float32),
        w3=0.1 * jax.random.normal(k3, (h2, n_out), jnp.float32),
        b3=jnp.zeros((n_out,), jnp.float32),
    )


def _reference_forward(x, p):
    h = jnp.tanh(x @ p["w1"] + p["b1"])
    h = jnp.tanh(h @ p["w2"] + p["b2"])
    return h @ p["w3"] + p["b3"]


if __name__ == "__main__":
    key = jax.random.PRNGKey(0)
    k_param, k_x = jax.random.split(key)

    # cmd_args.anion_latent_dim = 64, cmd_args.cation_latent_dim = 64
    # -> Linear(128, 64) -> Tanh -> Linear(64, 30) -> Tanh -> Linear(30, 1)
    anion_dim, cation_dim = 64, 64
    batch = 8

    params = init_params(k_param, anion_dim, cation_dim)
    x = jax.random.normal(k_x, (batch, anion_dim + cation_dim), jnp.float32)

    fwd = jax.jit(functools.partial(zsdiff_forward))
    out = jax.block_until_ready(fwd(x, params))

    assert out.shape == (batch, 1), out.shape
    assert out.dtype == jnp.float32

    ref = _reference_forward(x, params)
    assert jnp.allclose(out, ref, atol=1e-5, rtol=1e-5), float(
        jnp.max(jnp.abs(out - ref)))

    print("KERNEL_OK")
</pallas_src>

<mosaic_0001>
module attributes {stable_mosaic.version = 11 : i64} {
  func.func @_zsdiff_kernel(%arg0: i32, %arg1: memref<8x128xf32, #tpu.memory_space<vmem>>, %arg2: memref<128x64xf32, #tpu.memory_space<vmem>>, %arg3: memref<1x64xf32, #tpu.memory_space<vmem>>, %arg4: memref<64x30xf32, #tpu.memory_space<vmem>>, %arg5: memref<1x30xf32, #tpu.memory_space<vmem>>, %arg6: memref<30x1xf32, #tpu.memory_space<vmem>>, %arg7: memref<1x1xf32, #tpu.memory_space<vmem>>, %arg8: memref<8x1xf32, #tpu.memory_space<vmem>>) attributes {dimension_semantics = [#tpu.dimension_semantics<parallel>], iteration_bounds = array<i64: 1>, scalar_prefetch = 0 : i64, scratch_operands = 0 : i64, tpu.core_type = #tpu.core_type<tc>, window_params = [{transform_indices = @transform_0, window_bounds = array<i64: 8, 128>}, {pipeline_mode = #tpu.pipeline_mode<synchronous>, transform_indices = @transform_1, window_bounds = array<i64: 128, 64>}, {pipeline_mode = #tpu.pipeline_mode<synchronous>, transform_indices = @transform_2, window_bounds = array<i64: 1, 64>}, {pipeline_mode = #tpu.pipeline_mode<synchronous>, transform_indices = @transform_3, window_bounds = array<i64: 64, 30>}, {pipeline_mode = #tpu.pipeline_mode<synchronous>, transform_indices = @transform_4, window_bounds = array<i64: 1, 30>}, {pipeline_mode = #tpu.pipeline_mode<synchronous>, transform_indices = @transform_5, window_bounds = array<i64: 30, 1>}, {pipeline_mode = #tpu.pipeline_mode<synchronous>, transform_indices = @transform_6, window_bounds = array<i64: 1, 1>}, {transform_indices = @transform_7, window_bounds = array<i64: 8, 1>}]} {
    %c0 = arith.constant 0 : index
    %c0_0 = arith.constant 0 : index
    %0 = vector.load %arg1[%c0, %c0_0] : memref<8x128xf32, #tpu.memory_space<vmem>>, vector<8x128xf32>
    %c0_1 = arith.constant 0 : index
    %c0_2 = arith.constant 0 : index
    %1 = vector.load %arg2[%c0_1, %c0_2] : memref<128x64xf32, #tpu.memory_space<vmem>>, vector<128x64xf32>
    %cst = arith.constant dense<0.000000e+00> : vector<8x64xf32>
    %2 = tpu.matmul %0, %1, %cst {dimension_numbers = #tpu.dot_dimension_numbers<[1], [0], [0], [1], [0, 0, 1, 1], [], []>} : vector<8x128xf32>, vector<128x64xf32>, vector<8x64xf32> -> vector<8x64xf32>
    %c0_3 = arith.constant 0 : index
    %c0_4 = arith.constant 0 : index
    %3 = vector.load %arg3[%c0_3, %c0_4] : memref<1x64xf32, #tpu.memory_space<vmem>>, vector<1x64xf32>
    %4 = vector.broadcast %3 : vector<1x64xf32> to vector<8x64xf32>
    %5 = arith.addf %2, %4 : vector<8x64xf32>
    %6 = math.tanh %5 : vector<8x64xf32>
    %c0_5 = arith.constant 0 : index
    %c0_6 = arith.constant 0 : index
    %7 = vector.load %arg4[%c0_5, %c0_6] : memref<64x30xf32, #tpu.memory_space<vmem>>, vector<64x30xf32>
    %cst_7 = arith.constant dense<0.000000e+00> : vector<8x30xf32>
    %8 = tpu.matmul %6, %7, %cst_7 {dimension_numbers = #tpu.dot_dimension_numbers<[1], [0], [0], [1], [0, 0, 1, 1], [], []>} : vector<8x64xf32>, vector<64x30xf32>, vector<8x30xf32> -> vector<8x30xf32>
    %c0_8 = arith.constant 0 : index
    %c0_9 = arith.constant 0 : index
    %9 = vector.load %arg5[%c0_8, %c0_9] : memref<1x30xf32, #tpu.memory_space<vmem>>, vector<1x30xf32>
    %10 = vector.broadcast %9 : vector<1x30xf32> to vector<8x30xf32>
    %11 = arith.addf %8, %10 : vector<8x30xf32>
    %12 = math.tanh %11 : vector<8x30xf32>
    %c0_10 = arith.constant 0 : index
    %c0_11 = arith.constant 0 : index
    %13 = vector.load %arg6[%c0_10, %c0_11] : memref<30x1xf32, #tpu.memory_space<vmem>>, vector<30x1xf32>
    %cst_12 = arith.constant dense<0.000000e+00> : vector<8x1xf32>
    %14 = tpu.matmul %12, %13, %cst_12 {dimension_numbers = #tpu.dot_dimension_numbers<[1], [0], [0], [1], [0, 0, 1, 1], [], []>} : vector<8x30xf32>, vector<30x1xf32>, vector<8x1xf32> -> vector<8x1xf32>
    %c0_13 = arith.constant 0 : index
    %c0_14 = arith.constant 0 : index
    %15 = vector.load %arg7[%c0_13, %c0_14] : memref<1x1xf32, #tpu.memory_space<vmem>>, vector<1x1xf32>
    %16 = vector.broadcast %15 : vector<1x1xf32> to vector<8x1xf32>
    %17 = arith.addf %14, %16 : vector<8x1xf32>
    %c0_15 = arith.constant 0 : index
    %c0_16 = arith.constant 0 : index
    %18 = vector.load %arg8[%c0_15, %c0_16] : memref<8x1xf32, #tpu.memory_space<vmem>>, vector<8x1xf32>
    tpu.vector_store %arg8[%c0_15, %c0_16], %17 {strides = array<i32>} : memref<8x1xf32, #tpu.memory_space<vmem>>, vector<8x1xf32>,
    return
  }
  func.func @transform_0(%arg0: i32) -> (i32, i32) {
    %c0_i32 = arith.constant 0 : i32
    %c0_i32_0 = arith.constant 0 : i32
    return %arg0, %c0_i32 : i32, i32
  }
  func.func @transform_1(%arg0: i32) -> (i32, i32) {
    %c0_i32 = arith.constant 0 : i32
    %c0_i32_0 = arith.constant 0 : i32
    %c0_i32_1 = arith.constant 0 : i32
    return %c0_i32, %c0_i32_0 : i32, i32
  }
  func.func @transform_2(%arg0: i32) -> (i32, i32) {
    %c0_i32 = arith.constant 0 : i32
    %c0_i32_0 = arith.constant 0 : i32
    %c0_i32_1 = arith.constant 0 : i32
    return %c0_i32, %c0_i32_0 : i32, i32
  }
  func.func @transform_3(%arg0: i32) -> (i32, i32) {
    %c0_i32 = arith.constant 0 : i32
    %c0_i32_0 = arith.constant 0 : i32
    %c0_i32_1 = arith.constant 0 : i32
    return %c0_i32, %c0_i32_0 : i32, i32
  }
  func.func @transform_4(%arg0: i32) -> (i32, i32) {
    %c0_i32 = arith.constant 0 : i32
    %c0_i32_0 = arith.constant 0 : i32
    %c0_i32_1 = arith.constant 0 : i32
    return %c0_i32, %c0_i32_0 : i32, i32
  }
  func.func @transform_5(%arg0: i32) -> (i32, i32) {
    %c0_i32 = arith.constant 0 : i32
    %c0_i32_0 = arith.constant 0 : i32
    %c0_i32_1 = arith.constant 0 : i32
    return %c0_i32, %c0_i32_0 : i32, i32
  }
  func.func @transform_6(%arg0: i32) -> (i32, i32) {
    %c0_i32 = arith.constant 0 : i32
    %c0_i32_0 = arith.constant 0 : i32
    %c0_i32_1 = arith.constant 0 : i32
    return %c0_i32, %c0_i32_0 : i32, i32
  }
  func.func @transform_7(%arg0: i32) -> (i32, i32) {
    %c0_i32 = arith.constant 0 : i32
    %c0_i32_0 = arith.constant 0 : i32
    return %arg0, %c0_i32 : i32, i32
  }
}

</mosaic_0001>

<bundles_post_ra>
// kernel: zsdiff_forward.1
= control target key start
LH: loop header
LB: loop body
LE: loop exit
PB: predicated region body
PF: predicated region fallthrough
CT: control target
= control target key end

     0   :  { %v461_v0 = vmov 0.0|0.0   ;;  %vm462_vm0 = vmmov 0   ;;  %v463_v4 = vmov 0.0   ;;  %vm138_vm1 = vcmask 523264   ;;  %s624_s1 = inlined_call_operand.vmem [shape: f32[128,64], index: 1, kind: input, shape index: {}]   ;;  %s625_s3 = inlined_call_operand.vmem [shape: f32[64,30], index: 3, kind: input, shape index: {}]   ;;  %s626_s0 = inlined_call_operand.vmem [shape: f32[8,128], index: 0, kind: input, shape index: {}]   ;;  %s627_s2 = inlined_call_operand.vmem [shape: f32[1,64], index: 2, kind: input, shape index: {}]   ;;  %s628_s5 = inlined_call_operand.vmem [shape: f32[30,1], index: 5, kind: input, shape index: {}]   ;;  %s629_s6 = inlined_call_operand.<no memory space> [shape: f32[1,1], index: 6, kind: input, shape index: {}]   ;;  %s630_s4 = inlined_call_operand.vmem [shape: f32[1,30], index: 4, kind: input, shape index: {}]   ;;  %s631_s7 = inlined_call_operand.vmem [shape: f32[8,1], index: 7, kind: output, shape index: {}]  }
   0x1   :  { %410 = vmatprep.subr.bf16.mxu0 %v461_v0  ;;  %v29_v1 = vld [vmem:[%s624_s1] sm:$0xff]  ;;  %v30_v2 = vld [vmem:[%s624_s1 + $0x8] sm:$0xff]  ;;  %v31_v3 = vld [vmem:[%s624_s1 + $0x10] sm:$0xff]  ;;  %377 = vmatprep.mubr.msk.f32.mxu0 %vm462_vm0, %v463_v4  ;;  %vm228_vm2 = vcmask 1045504   ;;  %vm464_vm3 = vmmov 1   ;;  %v12_v50 = vstv %s629_s6  ;;  %vm224_vm5 = vcmask 244736  }
   0x2   :  { %v411_v5 = vpack.c.bf16 %v30_v2, %v29_v1  ;;  %v32_v6 = vld [vmem:[%s624_s1 + $0x18] sm:$0xff]  ;;  %434 = vmatprep.subr.bf16.mxu1 %v461_v0  ;;  %396 = vmatprep.mubr.msk.f32.mxu1 %vm462_vm0, %v463_v4  ;;  %v33_v8 = vld [vmem:[%s624_s1 + $0x20] sm:$0xff]  ;;  %v34_v9 = vld [vmem:[%s624_s1 + $0x28] sm:$0xff]  ;;  %13 = vst [vmem:[#allocation2] sm:$0x1] %v12_v50  ;;  %vm302_vm6 = vcmask 7168  }
   0x3   :  { %v414_v7 = vpack.c.bf16 %v32_v6, %v31_v3  ;;  %v123_v10 = vld [vmem:[%s625_s3] sm:$0xff]  ;;  %v124_v11 = vld [vmem:[%s625_s3 + $0x8] sm:$0xff]  ;;  %v417_v12 = vpack.c.bf16 %v34_v9, %v33_v8  ;;  %v35_v14 = vld [vmem:[%s624_s1 + $0x30] sm:$0xff] }
   0x4   :  { %412 = vmatpush3.bf16.msra.mxu0 %v411_v5  ;;  %v435_v13 = vpack.c.bf16 %v124_v11, %v123_v10  ;;  %v36_v15 = vld [vmem:[%s624_s1 + $0x38] sm:$0xff]  ;;  %v37_v17 = vld [vmem:[%s624_s1 + $0x40] sm:$0xff]  ;;  %v38_v18 = vld [vmem:[%s624_s1 + $0x48] sm:$0xff] }
   0x5   :  { %413 = vmatprep.subr.bf16.mxu0 %v461_v0  ;;  %v420_v16 = vpack.c.bf16 %v36_v15, %v35_v14  ;;  %v423_v19 = vpack.c.bf16 %v38_v18, %v37_v17  ;;  %v39_v20 = vld [vmem:[%s624_s1 + $0x50] sm:$0xff]  ;;  %v40_v21 = vld [vmem:[%s624_s1 + $0x58] sm:$0xff]  ;;  %v41_v23 = vld [vmem:[%s624_s1 + $0x60] sm:$0xff] }
   0x6   :  { %436 = vmatpush3.bf16.msra.mxu1 %v435_v13  ;;  %v426_v22 = vpack.c.bf16 %v40_v21, %v39_v20  ;;  %v42_v24 = vld [vmem:[%s624_s1 + $0x68] sm:$0xff]  ;;  %v43_v26 = vld [vmem:[%s624_s1 + $0x70] sm:$0xff]  ;;  %v44_v27 = vld [vmem:[%s624_s1 + $0x78] sm:$0xff] }
   0x7   :  { %437 = vmatprep.subr.bf16.mxu1 %v461_v0  ;;  %v429_v25 = vpack.c.bf16 %v42_v24, %v41_v23  ;;  %v432_v28 = vpack.c.bf16 %v44_v27, %v43_v26  ;;  %v28_v29 = vld [vmem:[%s626_s0] sm:$0xff]  ;;  %v125_v30 = vld [vmem:[%s625_s3 + $0x10] sm:$0xff]  ;;  %v126_v31 = vld [vmem:[%s625_s3 + $0x18] sm:$0xff] }
   0x8   :  { %415 = vmatpush3.bf16.msra.mxu0 %v414_v7  ;;  %v438_v32 = vpack.c.bf16 %v126_v31, %v125_v30  ;;  %v127_v33 = vld [vmem:[%s625_s3 + $0x20] sm:$0xff]  ;;  %v128_v34 = vld [vmem:[%s625_s3 + $0x28] sm:$0xff]  ;;  %v129_v36 = vld [vmem:[%s625_s3 + $0x30] sm:$0xff] }
   0x9   :  { %416 = vmatprep.subr.bf16.mxu0 %v461_v0  ;;  %v441_v35 = vpack.c.bf16 %v128_v34, %v127_v33  ;;  %v130_v37 = vld [vmem:[%s625_s3 + $0x38] sm:$0xff]  ;;  %v308_v39 = vld [vmem:[%s627_s2] ss:$0 sm:$0xff]  ;;  %v214_v45 = vld [vmem:[%s628_s5 + $0x8] sm:$0xff] }
   0xa   :  { %439 = vmatpush3.bf16.msra.mxu1 %v438_v32  ;;  %v444_v38 = vpack.c.bf16 %v130_v37, %v129_v36  ;;  %v213_v44 = vld [vmem:[%s628_s5] sm:$0xff]  ;;  %v215_v46 = vld [vmem:[%s628_s5 + $0x10] sm:$0xff]  ;;  %v216_v48 = vld [vmem:[%s628_s5 + $0x18] sm:$0x3f] }
   0xb   :  { %440 = vmatprep.subr.bf16.mxu1 %v461_v0  ;;  %v447_v47 = vpack.c.bf16 %v214_v45, %v213_v44  ;;  %v450_v49 = vpack.c.bf16 %v216_v48, %v215_v46  ;;  %vm451_vm4 = vmpackc.low %vm228_vm2, %vm464_vm3  ;;  %v309_v51 = vld [vmem:[%s630_s4] ss:$0 sm:$0xff] }
   0xc   :  { %418 = vmatpush3.bf16.msra.mxu0 %v417_v12  ;;  %v311_v56 = vld [vmem:[#allocation2] ss:$0 sm:$0xff] }
   0xd   :  { %419 = vmatprep.subr.bf16.mxu0 %v461_v0 }
   0xe   :  { %442 = vmatpush3.bf16.msra.mxu1 %v441_v35 }
   0xf   :  { %443 = vmatprep.subr.bf16.mxu1 %v461_v0 }
  0x10   :  { %421 = vmatpush3.bf16.msra.mxu0 %v420_v16 }
  0x11   :  { %422 = vmatprep.subr.bf16.mxu0 %v461_v0 }
  0x12   :  { %445 = vmatpush3.bf16.msra.mxu1 %v444_v38 }
  0x13   :  { %446 = vmatprep.subr.bf16.mxu1 %v461_v0 }
  0x14   :  { %424 = vmatpush3.bf16.msra.mxu0 %v423_v19 }
  0x15   :  { %425 = vmatprep.subr.bf16.mxu0 %v461_v0 }
  0x18   :  { %427 = vmatpush3.bf16.msra.mxu0 %v426_v22 }
  0x19   :  { %428 = vmatprep.subr.bf16.mxu0 %v461_v0 }
  0x1c   :  { %430 = vmatpush3.bf16.msra.mxu0 %v429_v25 }
  0x1d   :  { %431 = vmatprep.subr.bf16.mxu0 %v461_v0 }
  0x20   :  { %433 = vmatpush3.bf16.msra.mxu0 %v432_v28 }
  0x23   :  { %378 = vmatmul.mubr.f32.vlgmr.msra.gmra.mrb[0].mxu0 %v28_v29 }
  0xf6   :  { %v118_v40 = vpop.f32.mrb[0].mxu0 }
  0xf7   :  { %v119_v41 = vadd.f32 %v308_v39, %v118_v40  ;;  %v379_v42 = vpop.f32.mrb[1].mxu0 }
  0xf9   :  { %457 = vtanh.f32 %v119_v41 }
 0x103   :  { %v458_v43 = vpop.eup %457 }
 0x104   :  { %397 = vmatmul.mubr.msk.f32.vlgmr.msra.gmra.mrb[0].mxu1 %vm138_vm1, %v458_v43 }
 0x105   :  { %407 = vmatprep.mubr.msk.f32.mxu1 %vm462_vm0, %v463_v4  ;;  %448 = vmatpush3.bf16.msra.mxu1 %v447_v47 }
 0x106   :  { %449 = vmatprep.subr.bf16.mxu1 %v461_v0 }
 0x109   :  { %452 = vmatpush3.bf16.msk.msra.mxu1 %vm451_vm4, %v450_v49 }
 0x1d7   :  { %v208_v52 = vpop.f32.mrb[0].mxu1 }
 0x1d8   :  { %v209_v53 = vadd.f32 %v309_v51, %v208_v52  ;;  %v398_v54 = vpop.f32.mrb[1].mxu1 }
 0x1da   :  { %459 = vtanh.f32 %v209_v53 }
 0x1e4   :  { %v460_v55 = vpop.eup %459 }
 0x1e5   :  { %408 = vmatmul.mubr.msk.f32.vlgmr.msra.gmra.mrb[2].mxu1 %vm224_vm5, %v460_v55 }
 0x2b8   :  { %v298_v57 = vpop.f32.mrb[2].mxu1 }
 0x2b9   :  { %v299_v58 = vadd.f32 %v311_v56, %v298_v57  ;;  %v409_v59 = vpop.f32.mrb[3].mxu1 }
 0x2bb   :  { %303 = vst.msk [vmem:[%s631_s7] sm:$0xff] %vm302_vm6, %v299_v58 }

</bundles_post_ra>
